<compile_context>
chip_gen: v6e
topology: v6e:2x2x1
jax: 0.10.0
libtpu: 0.0.40
codegen_flags: <defaults>
</compile_context>

<pallas_src>
import numpy as np
import jax
import jax.numpy as jnp
from jax.experimental import pallas as pl
from jax.experimental.pallas import tpu as pltpu


def _round_up(x, m):
    return (x + m - 1) // m * m


# ----------------------------- Pallas kernel -----------------------------

def _conv1x1_kernel(x_ref, w_ref, b_ref, o_ref):
    # x_ref: (BB, Cin, TN)   activations, spatial on lanes, native dtype
    # w_ref: (Cout, Cin)     conv weight (resident every grid step)
    # b_ref: (Cout, 1)       f32 bias, broadcast over lanes
    # o_ref: (BB, Cout, TN)  lane-dense output tile
    w = w_ref[...]
    b = b_ref[...]
    # Full f32 contract precision only when inputs are f32 (matches PyTorch numerics);
    # bf16 inputs go straight to the native MXU path with f32 accumulate.
    prec = jax.lax.Precision.HIGHEST if x_ref.dtype == jnp.float32 else None
    for i in range(x_ref.shape[0]):            # BB is small & static -> unrolled
        acc = jnp.dot(w, x_ref[i], preferred_element_type=jnp.float32,
                      precision=prec) + b
        o_ref[i] = acc.astype(o_ref.dtype)


# ----------------------------- wrapper -----------------------------

def out_conv(x_nchw, weight, bias, *, tile_n=None):
    """OutConv.forward: 1x1 Conv2d.

    x_nchw : (B, Cin, H, W)    NCHW, as in the PyTorch module
    weight : (Cout, Cin, 1, 1) PyTorch Conv2d weight layout
    bias   : (Cout,)
    returns: (B, Cout, H, W), same dtype as x
    """
    B, Cin, H, W = x_nchw.shape
    Cout = weight.shape[0]
    HW = H * W

    x = x_nchw.reshape(B, Cin, HW)                      # free reshape, native dtype
    out_dtype = x.dtype
    w2d = weight.reshape(Cout, Cin).astype(x.dtype)     # tiny; match activation dtype
    b2d = bias.reshape(Cout, 1).astype(jnp.float32)     # f32 bias for f32 accumulate

    x_item = x.dtype.itemsize
    o_item = jnp.dtype(out_dtype).itemsize

    # Per-generation VMEM capacity (v7x: 64 MiB, v5e/v6e: 128 MiB); conservative fallback.
    try:
        vmem_cap = int(pltpu.get_tpu_info().vmem_capacity_bytes)
    except Exception:
        vmem_cap = 64 << 20
    tile_budget = vmem_cap // 3                         # budget for double-buffered tiles

    # Fold the batch into the block for tiny problems (amortize ~0.35us per grid step).
    total_bytes = B * HW * (Cin * x_item + Cout * o_item)
    bb = B if (B > 1 and 2 * total_bytes <= min(tile_budget, 4 << 20)) else 1

    # Double-buffered bytes per lane column of one grid step (input + output tiles).
    per_lane = 2 * bb * (_round_up(Cin, 8) * x_item + _round_up(Cout, 8) * o_item)

    # Spatial (lane) tile: full-HW slab by default, else a lane-dense multiple of 128.
    if tile_n is None or tile_n >= HW:
        tile_n = HW
    else:
        tile_n = max(128, _round_up(tile_n, 128))
        if tile_n >= HW:
            tile_n = HW
    max_lanes = max(128, (tile_budget // per_lane) // 128 * 128)
    if tile_n > max_lanes:
        tile_n = max_lanes

    # v7x has 2 TensorCores; with B == 1 make sure there are >= 2 "parallel" steps.
    if B == 1 and HW > 128 and pl.cdiv(HW, tile_n) == 1:
        tile_n = _round_up(pl.cdiv(HW, 2), 128)

    n_tiles = pl.cdiv(HW, tile_n)
    grid = (B // bb, n_tiles)

    # VMEM limit derived from the actual footprint: double-buffered in+out tiles,
    # resident weight/bias (padded), plus headroom; capped below physical capacity.
    lane_pad = _round_up(tile_n, 128)
    tile_bytes = bb * lane_pad * (_round_up(Cin, 8) * x_item + _round_up(Cout, 8) * o_item)
    resident = 2 * _round_up(Cout, 8) * (_round_up(Cin, 128) * x_item + 128 * 4)
    vmem_limit = 2 * tile_bytes + resident + (4 << 20)
    vmem_limit = int(min(max(vmem_limit, 16 << 20), vmem_cap - (8 << 20)))

    out = pl.pallas_call(
        _conv1x1_kernel,
        grid=grid,
        in_specs=[
            pl.BlockSpec((bb, Cin, tile_n), lambda i, j: (i, 0, j)),
            pl.BlockSpec((Cout, Cin), lambda i, j: (0, 0)),
            pl.BlockSpec((Cout, 1), lambda i, j: (0, 0)),
        ],
        out_specs=pl.BlockSpec((bb, Cout, tile_n), lambda i, j: (i, 0, j)),
        out_shape=jax.ShapeDtypeStruct((B, Cout, HW), out_dtype),
        compiler_params=pltpu.CompilerParams(
            dimension_semantics=("parallel", "parallel"),
            vmem_limit_bytes=vmem_limit,
        ),
    )(x, w2d, b2d)

    return out.reshape(B, Cout, H, W)


# ----------------------------- main -----------------------------

if __name__ == "__main__":
    # Shapes consistent with the module's use inside the U-Net (OutConv(32, n_classes)).
    in_channels, out_channels = 32, 3
    B, H, W = 2, 16, 16

    key = jax.random.PRNGKey(0)
    kx, kw, kb = jax.random.split(key, 3)
    x = jax.random.normal(kx, (B, in_channels, H, W), jnp.float32)
    weight = (jax.random.normal(kw, (out_channels, in_channels, 1, 1), jnp.float32)
              / np.sqrt(in_channels))
    bias = jax.random.normal(kb, (out_channels,), jnp.float32) * 0.01

    fn = jax.jit(out_conv)
    y = fn(x, weight, bias)
    jax.block_until_ready(y)

    assert y.shape == (B, out_channels, H, W), y.shape
    assert bool(jnp.all(jnp.isfinite(y)))

    # Exact float64 reference computed on the host (kernel runs full-precision f32).
    ref = (np.einsum(
              "oc,bchw->bohw",
              np.asarray(weight, dtype=np.float64).reshape(out_channels, in_channels),
              np.asarray(x, dtype=np.float64))
           + np.asarray(bias, dtype=np.float64).reshape(1, -1, 1, 1))
    np.testing.assert_allclose(np.asarray(y, dtype=np.float64), ref,
                               rtol=1e-5, atol=1e-5)

    print("KERNEL_OK")
</pallas_src>

<mosaic_0001>
module attributes {stable_mosaic.version = 11 : i64} {
  func.func @_conv1x1_kernel(%arg0: i32, %arg1: i32, %arg2: memref<2x32x256xf32, #tpu.memory_space<vmem>>, %arg3: memref<3x32xf32, #tpu.memory_space<vmem>>, %arg4: memref<3x1xf32, #tpu.memory_space<vmem>>, %arg5: memref<2x3x256xf32, #tpu.memory_space<vmem>>) attributes {dimension_semantics = [#tpu.dimension_semantics<parallel>, #tpu.dimension_semantics<parallel>], iteration_bounds = array<i64: 1, 1>, scalar_prefetch = 0 : i64, scratch_operands = 0 : i64, tpu.core_type = #tpu.core_type<tc>, window_params = [{transform_indices = @transform_0, window_bounds = array<i64: 2, 32, 256>}, {pipeline_mode = #tpu.pipeline_mode<synchronous>, transform_indices = @transform_1, window_bounds = array<i64: 3, 32>}, {pipeline_mode = #tpu.pipeline_mode<synchronous>, transform_indices = @transform_2, window_bounds = array<i64: 3, 1>}, {transform_indices = @transform_3, window_bounds = array<i64: 2, 3, 256>}]} {
    %c0 = arith.constant 0 : index
    %c0_0 = arith.constant 0 : index
    %0 = vector.load %arg3[%c0, %c0_0] : memref<3x32xf32, #tpu.memory_space<vmem>>, vector<3x32xf32>
    %c0_1 = arith.constant 0 : index
    %c0_2 = arith.constant 0 : index
    %1 = vector.load %arg4[%c0_1, %c0_2] : memref<3x1xf32, #tpu.memory_space<vmem>>, vector<3x1xf32>
    %c0_3 = arith.constant 0 : index
    %c0_4 = arith.constant 0 : index
    %c0_5 = arith.constant 0 : index
    %2 = vector.load %arg2[%c0_3, %c0_4, %c0_5] : memref<2x32x256xf32, #tpu.memory_space<vmem>>, vector<1x32x256xf32>
    %3 = vector.shape_cast %2 : vector<1x32x256xf32> to vector<32x256xf32>
    %cst = arith.constant dense<0.000000e+00> : vector<3x256xf32>
    %4 = tpu.matmul %0, %3, %cst {dimension_numbers = #tpu.dot_dimension_numbers<[1], [0], [0], [1], [0, 0, 1, 1], [], []>, precision = #tpu.contract_precision<fp32>} : vector<3x32xf32>, vector<32x256xf32>, vector<3x256xf32> -> vector<3x256xf32>
    %5 = vector.broadcast %1 : vector<3x1xf32> to vector<3x256xf32>
    %6 = arith.addf %4, %5 : vector<3x256xf32>
    %c0_6 = arith.constant 0 : index
    %c0_7 = arith.constant 0 : index
    %c0_8 = arith.constant 0 : index
    %7 = vector.load %arg5[%c0_6, %c0_7, %c0_8] : memref<2x3x256xf32, #tpu.memory_space<vmem>>, vector<1x3x256xf32>
    %8 = vector.shape_cast %7 : vector<1x3x256xf32> to vector<3x256xf32>
    %9 = vector.shape_cast %6 : vector<3x256xf32> to vector<1x3x256xf32>
    tpu.vector_store %arg5[%c0_6, %c0_7, %c0_8], %9 {strides = array<i32>} : memref<2x3x256xf32, #tpu.memory_space<vmem>>, vector<1x3x256xf32>,
    %c1 = arith.constant 1 : index
    %c0_9 = arith.constant 0 : index
    %c0_10 = arith.constant 0 : index
    %10 = vector.load %arg2[%c1, %c0_9, %c0_10] : memref<2x32x256xf32, #tpu.memory_space<vmem>>, vector<1x32x256xf32>
    %11 = vector.shape_cast %10 : vector<1x32x256xf32> to vector<32x256xf32>
    %cst_11 = arith.constant dense<0.000000e+00> : vector<3x256xf32>
    %12 = tpu.matmul %0, %11, %cst_11 {dimension_numbers = #tpu.dot_dimension_numbers<[1], [0], [0], [1], [0, 0, 1, 1], [], []>, precision = #tpu.contract_precision<fp32>} : vector<3x32xf32>, vector<32x256xf32>, vector<3x256xf32> -> vector<3x256xf32>
    %13 = vector.broadcast %1 : vector<3x1xf32> to vector<3x256xf32>
    %14 = arith.addf %12, %13 : vector<3x256xf32>
    %c1_12 = arith.constant 1 : index
    %c0_13 = arith.constant 0 : index
    %c0_14 = arith.constant 0 : index
    %15 = vector.load %arg5[%c1_12, %c0_13, %c0_14] : memref<2x3x256xf32, #tpu.memory_space<vmem>>, vector<1x3x256xf32>
    %16 = vector.shape_cast %15 : vector<1x3x256xf32> to vector<3x256xf32>
    %17 = vector.shape_cast %14 : vector<3x256xf32> to vector<1x3x256xf32>
    tpu.vector_store %arg5[%c1_12, %c0_13, %c0_14], %17 {strides = array<i32>} : memref<2x3x256xf32, #tpu.memory_space<vmem>>, vector<1x3x256xf32>,
    return
  }
  func.func @transform_0(%arg0: i32, %arg1: i32) -> (i32, i32, i32) {
    %c0_i32 = arith.constant 0 : i32
    %c0_i32_0 = arith.constant 0 : i32
    return %arg0, %c0_i32, %arg1 : i32, i32, i32
  }
  func.func @transform_1(%arg0: i32, %arg1: i32) -> (i32, i32) {
    %c0_i32 = arith.constant 0 : i32
    %c0_i32_0 = arith.constant 0 : i32
    %c0_i32_1 = arith.constant 0 : i32
    return %c0_i32, %c0_i32_0 : i32, i32
  }
  func.func @transform_2(%arg0: i32, %arg1: i32) -> (i32, i32) {
    %c0_i32 = arith.constant 0 : i32
    %c0_i32_0 = arith.constant 0 : i32
    %c0_i32_1 = arith.constant 0 : i32
    return %c0_i32, %c0_i32_0 : i32, i32
  }
  func.func @transform_3(%arg0: i32, %arg1: i32) -> (i32, i32, i32) {
    %c0_i32 = arith.constant 0 : i32
    %c0_i32_0 = arith.constant 0 : i32
    return %arg0, %c0_i32, %arg1 : i32, i32, i32
  }
}

</mosaic_0001>

<bundles_post_ra>
// kernel: out_conv.1
= control target key start
LH: loop header
LB: loop body
LE: loop exit
PB: predicated region body
PF: predicated region fallthrough
CT: control target
= control target key end

     0   :  { %v1155_v3 = vmov 0.0   ;;  %vm29_vm0 = vcmask 261120   ;;  %v1156_v10 = vmov 0   ;;  %s1506_s0 = inlined_call_operand.vmem [shape: f32[2,32,256], index: 0, kind: input, shape index: {}]   ;;  %s1507_s1 = inlined_call_operand.vmem [shape: f32[3,32], index: 1, kind: input, shape index: {}]   ;;  %s1508_s2 = inlined_call_operand.vmem [shape: f32[3,1], index: 2, kind: input, shape index: {}]   ;;  %s1509_s3 = inlined_call_operand.vmem [shape: f32[2,3,256], index: 3, kind: output, shape index: {}]  }
   0x1   :  { %v23_v0 = vld [vmem:[%s1506_s0 + $0x38] sm:$0xff]  ;;  %v22_v1 = vld [vmem:[%s1506_s0 + $0x30] sm:$0xff]  ;;  %v21_v2 = vld [vmem:[%s1506_s0 + $0x28] sm:$0xff]  ;;  %105 = vmatprep.mubr.f32.mxu0 %v1155_v3  ;;  %221 = vmatprep.mubr.f32.mxu1 %v1155_v3 }
   0x2   :  { %v1188_v4 = vand.u32 4294901760, %v23_v0  ;;  %v1190_v5 = vand.u32 4294901760, %v22_v1  ;;  %v1192_v6 = vand.u32 4294901760, %v21_v2  ;;  %v20_v7 = vld [vmem:[%s1506_s0 + $0x20] sm:$0xff]  ;;  %v19_v8 = vld [vmem:[%s1506_s0 + $0x18] sm:$0xff]  ;;  %v18_v9 = vld [vmem:[%s1506_s0 + $0x10] sm:$0xff]  ;;  %1154 = vset.pattern.permute.xlu0 %v1156_v10 }
   0x3   :  { %v1203_v11 = vand.u32 4294901760, %v20_v7  ;;  %v1205_v12 = vand.u32 4294901760, %v19_v8  ;;  %v1207_v13 = vand.u32 4294901760, %v18_v9  ;;  %v17_v14 = vld [vmem:[%s1506_s0 + $0x8] sm:$0xff]  ;;  %v16_v15 = vld [vmem:[%s1506_s0] sm:$0xff]  ;;  %v1150_v58 = vld [vmem:[%s1506_s0 + $0x78] sm:$0xff] }
   0x4   :  { %58 = vmatprep.subr.mxu0 %v1188_v4  ;;  %v1216_v16 = vand.u32 4294901760, %v17_v14  ;;  %v1219_v17 = vsub.f32 %v23_v0, %v1188_v4  ;;  %v1221_v18 = vand.u32 4294901760, %v16_v15  ;;  %v1224_v19 = vsub.f32 %v22_v1, %v1190_v5  ;;  %v14_v20 = vld [vmem:[%s1507_s1] sm:$0x7]  ;;  %v1149_v59 = vld [vmem:[%s1506_s0 + $0x70] sm:$0xff]  ;;  %v1148_v60 = vld [vmem:[%s1506_s0 + $0x68] sm:$0xff] }
   0x5   :  { %60 = vmatpush1.msra.mxu0 %v1190_v5  ;;  %v1231_v21 = vsub.f32 %v21_v2, %v1192_v6  ;;  %v31_v22 = vsel %vm29_vm0, %v14_v20, 0  ;;  %v1235_v23 = vsub.f32 %v20_v7, %v1203_v11  ;;  %v1238_v24 = vsub.f32 %v19_v8, %v1205_v12  ;;  %v15_v33 = vld [vmem:[%s1508_s2] sm:$0x7]  ;;  %v1146_v0 = vld [vmem:[%s1506_s0 + $0x58] sm:$0xff]  ;;  %v1145_v2 = vld [vmem:[%s1506_s0 + $0x50] sm:$0xff] }
   0x6   :  { %62 = vmatprep.subr.mxu0 %v1192_v6  ;;  %v143_v25 = vand.u32 4294901760, %v1219_v17  ;;  %v149_v26 = vand.u32 4294901760, %v1224_v19  ;;  %v1243_v27 = vand.u32 4294901760, %v31_v22  ;;  %v1246_v28 = vsub.f32 %v18_v9, %v1207_v13  ;;  %26 = vperm.xlu0 %1154, %v15_v33   ;;  %v1147_v62 = vld [vmem:[%s1506_s0 + $0x60] sm:$0xff]  ;;  %v1144_v8 = vld [vmem:[%s1506_s0 + $0x48] sm:$0xff] }
   0x7   :  { %64 = vmatpush1.msra.mxu0 %v1203_v11  ;;  %v155_v29 = vand.u32 4294901760, %v1231_v21  ;;  %v161_v30 = vand.u32 4294901760, %v1235_v23  ;;  %v167_v31 = vand.u32 4294901760, %v1238_v24  ;;  %v1253_v32 = vsub.f32 %v17_v14, %v1216_v16  ;;  %v1143_v14 = vld [vmem:[%s1506_s0 + $0x40] sm:$0xff] }
   0x8   :  { %66 = vmatprep.subr.mxu0 %v1205_v12  ;;  %v144_v34 = vsub.f32 %v1219_v17, %v143_v25  ;;  %v150_v35 = vsub.f32 %v1224_v19, %v149_v26  ;;  %v1266_v36 = vsub.f32 %v31_v22, %v1243_v27  ;;  %v173_v37 = vand.u32 4294901760, %v1246_v28 }
   0x9   :  { %68 = vmatpush1.msra.mxu0 %v1207_v13  ;;  %v156_v38 = vsub.f32 %v1231_v21, %v155_v29  ;;  %v162_v39 = vsub.f32 %v1235_v23, %v161_v30  ;;  %v168_v40 = vsub.f32 %v1238_v24, %v167_v31  ;;  %v179_v41 = vand.u32 4294901760, %v1253_v32 }
   0xa   :  { %70 = vmatprep.subr.mxu0 %v1216_v16  ;;  %v145_v42 = vand.u32 4294901760, %v144_v34  ;;  %v151_v43 = vand.u32 4294901760, %v150_v35  ;;  %v1282_v44 = vand.u32 4294901760, %v1266_v36  ;;  %v174_v45 = vsub.f32 %v1246_v28, %v173_v37 }
   0xb   :  { %72 = vmatpush1.msra.mxu0 %v1221_v18  ;;  %v157_v46 = vand.u32 4294901760, %v156_v38  ;;  %v163_v47 = vand.u32 4294901760, %v162_v39  ;;  %v180_v48 = vsub.f32 %v1253_v32, %v179_v41  ;;  %v169_v50 = vand.u32 4294901760, %v168_v40 }
   0xc   :  { %146 = vmatprep.subr.mxu1 %v145_v42  ;;  %255 = vmatprep.subr.mxu0 %v1219_v17  ;;  %v109_v49 = vsub.f32 %v1266_v36, %v1282_v44  ;;  %v1295_v51 = vsub.f32 %v16_v15, %v1221_v18  ;;  %v175_v52 = vand.u32 4294901760, %v174_v45  ;;  %v1320_v61 = vand.u32 4294901760, %v1150_v58 }
   0xd   :  { %152 = vmatpush1.msra.mxu1 %v151_v43  ;;  %v181_v54 = vand.u32 4294901760, %v180_v48  ;;  %v1327_v63 = vand.u32 4294901760, %v1149_v59  ;;  %v1334_v1 = vand.u32 4294901760, %v1148_v60  ;;  %v1342_v7 = vand.u32 4294901760, %v1147_v62 }
   0xe   :  { %158 = vmatprep.subr.mxu1 %v157_v46  ;;  %v1297_v53 = vand.u32 4294901760, %v109_v49  ;;  %v185_v55 = vand.u32 4294901760, %v1295_v51  ;;  %v1350_v9 = vand.u32 4294901760, %v1146_v0  ;;  %v1353_v10 = vsub.f32 %v1150_v58, %v1320_v61 }
   0xf   :  { %164 = vmatpush1.msra.mxu1 %v163_v47  ;;  %v1362_v15 = vsub.f32 %v1149_v59, %v1327_v63  ;;  %v1364_v17 = vand.u32 4294901760, %v1145_v2  ;;  %v1372_v20 = vsub.f32 %v1148_v60, %v1334_v1  ;;  %v1380_v22 = vand.u32 4294901760, %v1143_v14 }
  0x10   :  { %111 = vmatmul.mubr.f32.vlgmr.msra.gmra.mxu0 %v1297_v53  ;;  %170 = vmatprep.subr.mxu1 %v169_v50  ;;  %v186_v56 = vsub.f32 %v1295_v51, %v185_v55 }
  0x11   :  { %258 = vmatpush1.msra.mxu0 %v1224_v19  ;;  %176 = vmatpush1.msra.mxu1 %v175_v52  ;;  %v1369_v19 = vand.u32 4294901760, %v1144_v8 }
  0x12   :  { %261 = vmatprep.subr.mxu0 %v1231_v21  ;;  %182 = vmatprep.subr.mxu1 %v181_v54  ;;  %v187_v57 = vand.u32 4294901760, %v186_v56  ;;  %v1378_v21 = vsub.f32 %v1147_v62, %v1342_v7 }
  0x13   :  { %264 = vmatpush1.msra.mxu0 %v1235_v23  ;;  %309 = vmatprep.mubr.f32.mxu0 %v1155_v3  ;;  %v700_v23 = vand.u32 4294901760, %v1353_v10 }
  0x14   :  { %267 = vmatprep.subr.mxu0 %v1238_v24  ;;  %188 = vmatpush1.msra.mxu1 %v187_v57  ;;  %v1393_v24 = vsub.f32 %v1145_v2, %v1364_v17 }
  0x15   :  { %270 = vmatpush1.msra.mxu0 %v1246_v28  ;;  %223 = vmatmul.mubr.f32.vlgmr.msra.gmra.mxu1 %v1243_v27  ;;  %v712_v28 = vand.u32 4294901760, %v1372_v20 }
  0x16   :  { %273 = vmatprep.subr.mxu0 %v1253_v32  ;;  %343 = vmatprep.subr.mxu1 %v1188_v4  ;;  %v730_v33 = vand.u32 4294901760, %v1393_v24 }
  0x17   :  { %276 = vmatpush1.msra.mxu0 %v1295_v51  ;;  %345 = vmatpush1.msra.mxu1 %v1190_v5 }
  0x18   :  { %312 = vmatmul.mubr.f32.vlgmr.msra.gmra.mxu0 %v1266_v36  ;;  %347 = vmatprep.subr.mxu1 %v1192_v6  ;;  %v731_v38 = vsub.f32 %v1393_v24, %v730_v33 }
  0x19   :  { %427 = vmatprep.subr.mxu0 %v143_v25  ;;  %349 = vmatpush1.msra.mxu1 %v1203_v11  ;;  %v1387_v25 = vsub.f32 %v1146_v0, %v1350_v9 }
  0x1a   :  { %431 = vmatpush1.msra.mxu0 %v149_v26  ;;  %351 = vmatprep.subr.mxu1 %v1205_v12  ;;  %v706_v26 = vand.u32 4294901760, %v1362_v15  ;;  %v732_v42 = vand.u32 4294901760, %v731_v38 }
  0x1b   :  { %435 = vmatprep.subr.mxu0 %v155_v29  ;;  %353 = vmatpush1.msra.mxu1 %v1207_v13  ;;  %v1399_v29 = vsub.f32 %v1144_v8, %v1369_v19  ;;  %v724_v32 = vand.u32 4294901760, %v1387_v25 }
  0x1c   :  { %439 = vmatpush1.msra.mxu0 %v161_v30  ;;  %355 = vmatprep.subr.mxu1 %v1216_v16  ;;  %v1404_v30 = vsub.f32 %v1143_v14, %v1380_v22 }
  0x1d   :  { %443 = vmatprep.subr.mxu0 %v167_v31  ;;  %357 = vmatpush1.msra.mxu1 %v1221_v18  ;;  %v718_v31 = vand.u32 4294901760, %v1378_v21  ;;  %v736_v34 = vand.u32 4294901760, %v1399_v29 }
  0x1e   :  { %390 = vmatprep.mubr.f32.mxu1 %v1155_v3  ;;  %447 = vmatpush1.msra.mxu0 %v173_v37  ;;  %v742_v35 = vand.u32 4294901760, %v1404_v30  ;;  %v725_v37 = vsub.f32 %v1387_v25, %v724_v32 }
  0x1f   :  { %394 = vmatmul.mubr.f32.vlgmr.msra.gmra.mxu1 %v1282_v44  ;;  %451 = vmatprep.subr.mxu0 %v179_v41 }
  0x20   :  { %521 = vmatprep.subr.mxu1 %v1188_v4  ;;  %455 = vmatpush1.msra.mxu0 %v185_v55  ;;  %v701_v4 = vsub.f32 %v1353_v10, %v700_v23  ;;  %v726_v41 = vand.u32 4294901760, %v725_v37 }
  0x21   :  { %488 = vmatprep.mubr.f32.mxu0 %v1155_v3  ;;  %523 = vmatpush1.msra.mxu1 %v1190_v5  ;;  %v707_v5 = vsub.f32 %v1362_v15, %v706_v26 }
  0x22   :  { %490 = vmatmul.mubr.f32.vlgmr.msra.gmra.mxu0 %v1243_v27  ;;  %525 = vmatprep.subr.mxu1 %v1192_v6  ;;  %v713_v6 = vsub.f32 %v1372_v20, %v712_v28 }
  0x23   :  { %615 = vmatprep.subr.mxu0 %v1320_v61  ;;  %527 = vmatpush1.msra.mxu1 %v1203_v11  ;;  %v719_v11 = vsub.f32 %v1378_v21, %v718_v31 }
  0x24   :  { %617 = vmatpush1.msra.mxu0 %v1327_v63  ;;  %529 = vmatprep.subr.mxu1 %v1205_v12  ;;  %v702_v12 = vand.u32 4294901760, %v701_v4  ;;  %v714_v39 = vand.u32 4294901760, %v713_v6 }
  0x25   :  { %619 = vmatprep.subr.mxu0 %v1334_v1  ;;  %531 = vmatpush1.msra.mxu1 %v1207_v13  ;;  %v708_v13 = vand.u32 4294901760, %v707_v5  ;;  %v720_v40 = vand.u32 4294901760, %v719_v11 }
  0x26   :  { %621 = vmatpush1.msra.mxu0 %v1342_v7  ;;  %533 = vmatprep.subr.mxu1 %v1216_v16  ;;  %v737_v16 = vsub.f32 %v1399_v29, %v736_v34 }
  0x27   :  { %623 = vmatprep.subr.mxu0 %v1350_v9  ;;  %535 = vmatpush1.msra.mxu1 %v1221_v18  ;;  %v743_v18 = vsub.f32 %v1404_v30, %v742_v35 }
  0x28   :  { %568 = vmatprep.mubr.f32.mxu1 %v1155_v3  ;;  %625 = vmatpush1.msra.mxu0 %v1364_v17  ;;  %v738_v43 = vand.u32 4294901760, %v737_v16 }
  0x29   :  { %570 = vmatmul.mubr.f32.vlgmr.msra.gmra.mxu1 %v1243_v27  ;;  %627 = vmatprep.subr.mxu0 %v1369_v19  ;;  %v744_v45 = vand.u32 4294901760, %v743_v18 }
  0x2a   :  { %703 = vmatprep.subr.mxu1 %v702_v12  ;;  %629 = vmatpush1.msra.mxu0 %v1380_v22 }
  0x2b   :  { %709 = vmatpush1.msra.mxu1 %v708_v13  ;;  %662 = vmatprep.mubr.f32.mxu0 %v1155_v3 }
  0x2c   :  { %715 = vmatprep.subr.mxu1 %v714_v39  ;;  %812 = vmatprep.subr.mxu0 %v1353_v10 }
  0x2d   :  { %668 = vmatmul.mubr.f32.vlgmr.msra.gmra.mxu0 %v1297_v53  ;;  %721 = vmatpush1.msra.mxu1 %v720_v40 }
  0x2e   :  { %815 = vmatpush1.msra.mxu0 %v1362_v15  ;;  %727 = vmatprep.subr.mxu1 %v726_v41 }
  0x2f   :  { %818 = vmatprep.subr.mxu0 %v1372_v20  ;;  %733 = vmatpush1.msra.mxu1 %v732_v42 }
  0x30   :  { %821 = vmatpush1.msra.mxu0 %v1378_v21  ;;  %739 = vmatprep.subr.mxu1 %v738_v43 }
  0x31   :  { %824 = vmatprep.subr.mxu0 %v1387_v25  ;;  %745 = vmatpush1.msra.mxu1 %v744_v45 }
  0x32   :  { %778 = vmatprep.mubr.f32.mxu1 %v1155_v3  ;;  %827 = vmatpush1.msra.mxu0 %v1393_v24 }
  0x33   :  { %780 = vmatmul.mubr.f32.vlgmr.msra.gmra.mxu1 %v1243_v27  ;;  %830 = vmatprep.subr.mxu0 %v1399_v29 }
  0x34   :  { %900 = vmatprep.subr.mxu1 %v1320_v61  ;;  %833 = vmatpush1.msra.mxu0 %v1404_v30 }
  0x35   :  { %866 = vmatprep.mubr.f32.mxu0 %v1155_v3  ;;  %902 = vmatpush1.msra.mxu1 %v1327_v63 }
  0x36   :  { %869 = vmatmul.mubr.f32.vlgmr.msra.gmra.mxu0 %v1266_v36  ;;  %904 = vmatprep.subr.mxu1 %v1334_v1 }
  0x37   :  { %984 = vmatprep.subr.mxu0 %v700_v23  ;;  %906 = vmatpush1.msra.mxu1 %v1342_v7 }
  0x38   :  { %988 = vmatpush1.msra.mxu0 %v706_v26  ;;  %908 = vmatprep.subr.mxu1 %v1350_v9 }
  0x39   :  { %992 = vmatprep.subr.mxu0 %v712_v28  ;;  %910 = vmatpush1.msra.mxu1 %v1364_v17 }
  0x3a   :  { %996 = vmatpush1.msra.mxu0 %v718_v31  ;;  %912 = vmatprep.subr.mxu1 %v1369_v19 }
  0x3b   :  { %1000 = vmatprep.subr.mxu0 %v724_v32  ;;  %914 = vmatpush1.msra.mxu1 %v1380_v22 }
  0x3c   :  { %947 = vmatprep.mubr.f32.mxu1 %v1155_v3  ;;  %1004 = vmatpush1.msra.mxu0 %v730_v33 }
  0x3d   :  { %951 = vmatmul.mubr.f32.vlgmr.msra.gmra.mxu1 %v1282_v44  ;;  %1008 = vmatprep.subr.mxu0 %v736_v34 }
  0x3e   :  { %1078 = vmatprep.subr.mxu1 %v1320_v61  ;;  %1012 = vmatpush1.msra.mxu0 %v742_v35 }
  0x3f   :  { %1045 = vmatprep.mubr.f32.mxu0 %v1155_v3  ;;  %1080 = vmatpush1.msra.mxu1 %v1327_v63 }
  0x40   :  { %1047 = vmatmul.mubr.f32.vlgmr.msra.gmra.mxu0 %v1243_v27  ;;  %1082 = vmatprep.subr.mxu1 %v1334_v1 }
  0x41   :  { %1084 = vmatpush1.msra.mxu1 %v1342_v7  ;;  %1125 = vmatprep.mubr.f32.mxu1 %v1155_v3 }
  0x42   :  { %1086 = vmatprep.subr.mxu1 %v1350_v9 }
  0x43   :  { %1088 = vmatpush1.msra.mxu1 %v1364_v17 }
  0x44   :  { %1090 = vmatprep.subr.mxu1 %v1369_v19 }
  0x45   :  { %1092 = vmatpush1.msra.mxu1 %v1380_v22 }
  0x46   :  { %1127 = vmatmul.mubr.f32.vlgmr.msra.gmra.mxu1 %v1243_v27 }
  0x81   :  { %v27_v44 = vpop.permute.xlu0 %26 }
  0xd0   :  { %v112_v36 = vpop.f32.mrf.mxu0 }
  0xd1   :  { %v113_v49 = vadd.f32 %v112_v36, %v27_v44 }
  0xd2   :  { %v114_v46 = vpop.f32.mrf.mxu0 }
  0xd3   :  { %v115_v48 = vadd.f32 %v114_v46, %v27_v44 }
  0xd5   :  { %v224_v47 = vpop.f32.mrf.mxu1 }
  0xd6   :  { %v225_v3 = vadd.f32 %v224_v47, %v113_v49 }
  0xd7   :  { %v226_v50 = vpop.f32.mrf.mxu1 }
  0xd8   :  { %v313_v51 = vpop.f32.mrf.mxu0  ;;  %v227_v53 = vadd.f32 %v226_v50, %v115_v48 }
  0xd9   :  { %v314_v57 = vadd.f32 %v313_v51, %v225_v3 }
  0xda   :  { %v315_v54 = vpop.f32.mrf.mxu0 }
  0xdb   :  { %v316_v58 = vadd.f32 %v315_v54, %v227_v53 }
  0xdf   :  { %v395_v52 = vpop.f32.mrf.mxu1 }
  0xe0   :  { %v396_v59 = vadd.f32 %v395_v52, %v314_v57 }
  0xe1   :  { %v397_v55 = vpop.f32.mrf.mxu1 }
  0xe2   :  { %v491_v56 = vpop.f32.mrf.mxu0  ;;  %v398_v60 = vadd.f32 %v397_v55, %v316_v58 }
  0xe3   :  { %v492_v62 = vadd.f32 %v491_v56, %v396_v59 }
  0xe4   :  { %v493_v61 = vpop.f32.mrf.mxu0 }
  0xe5   :  { %v494_v63 = vadd.f32 %v493_v61, %v398_v60 }
  0xe9   :  { %v571_v27 = vpop.f32.mrf.mxu1 }
  0xea   :  { %v572_v1 = vadd.f32 %v571_v27, %v492_v62 }
  0xeb   :  { %v573_v0 = vpop.f32.mrf.mxu1 }
  0xec   :  { %v574_v2 = vadd.f32 %v573_v0, %v494_v63 }
  0xed   :  { %v669_v8 = vpop.f32.mrf.mxu0 }
  0xee   :  { %v578_v7 = vcombine.low %v572_v1, %v574_v2  ;;  %v670_v14 = vadd.f32 %v669_v8, %v27_v44 }
  0xef   :  { %v671_v9 = vpop.f32.mrf.mxu0 }
  0xf0   :  { %580 = vst [vmem:[%s1509_s3] sm:$0x77] %v578_v7  ;;  %v672_v15 = vadd.f32 %v671_v9, %v27_v44 }
  0xf3   :  { %v781_v10 = vpop.f32.mrf.mxu1 }
  0xf4   :  { %v782_v20 = vadd.f32 %v781_v10, %v670_v14 }
  0xf5   :  { %v783_v17 = vpop.f32.mrf.mxu1 }
  0xf6   :  { %v870_v19 = vpop.f32.mrf.mxu0  ;;  %v784_v21 = vadd.f32 %v783_v17, %v672_v15 }
  0xf7   :  { %v871_v26 = vadd.f32 %v870_v19, %v782_v20 }
  0xf8   :  { %v872_v23 = vpop.f32.mrf.mxu0 }
  0xf9   :  { %v873_v28 = vadd.f32 %v872_v23, %v784_v21 }
  0xfd   :  { %v952_v22 = vpop.f32.mrf.mxu1 }
  0xfe   :  { %v953_v29 = vadd.f32 %v952_v22, %v871_v26 }
  0xff   :  { %v954_v25 = vpop.f32.mrf.mxu1 }
 0x100   :  { %v1048_v24 = vpop.f32.mrf.mxu0  ;;  %v955_v30 = vadd.f32 %v954_v25, %v873_v28 }
 0x101   :  { %v1049_v32 = vadd.f32 %v1048_v24, %v953_v29 }
 0x102   :  { %v1050_v31 = vpop.f32.mrf.mxu0 }
 0x103   :  { %v1051_v5 = vadd.f32 %v1050_v31, %v955_v30 }
 0x106   :  { %v1128_v4 = vpop.f32.mrf.mxu1 }
 0x107   :  { %v1129_v6 = vadd.f32 %v1128_v4, %v1049_v32 }
 0x108   :  { %v1130_v33 = vpop.f32.mrf.mxu1 }
 0x109   :  { %v1131_v34 = vadd.f32 %v1130_v33, %v1051_v5 }
 0x10b   :  { %v1135_v11 = vcombine.low %v1129_v6, %v1131_v34 }
 0x10d   :  { %1151 = vst [vmem:[%s1509_s3 + $0x8] sm:$0x77] %v1135_v11 }

</bundles_post_ra>
